<compile_context>
chip_gen: v6e
topology: v6e:2x2x1
jax: 0.10.0
libtpu: 0.0.40
codegen_flags: <defaults>
</compile_context>

<pallas_src>
import functools
from typing import NamedTuple, Tuple

import jax
import jax.numpy as jnp
from jax.experimental import pallas as pl
from jax.experimental.pallas import tpu as pltpu

_LANES = 128
_SUBLANES = 8
_MIN_ROWS = _LANES * _SUBLANES      # 1024 rows -> one full (8,128) tile per feature


def _round_up(x: int, m: int) -> int:
    return ((x + m - 1) // m) * m


class PackedLayout(NamedTuple):
    """Static offsets into the 1-D packed parameter vector (Python ints only)."""
    dims: Tuple[int, ...]    # (in, h1, h2, h3, out)
    w_off: Tuple[int, ...]   # W_i flattened row-major as [out_i, in_i]
    b_off: Tuple[int, ...]   # bias of each linear
    s_off: Tuple[int, ...]   # folded BN scale (per BN layer)
    t_off: Tuple[int, ...]   # folded BN shift (per BN layer)
    size: int


def make_layout(layer_dims) -> PackedLayout:
    n_layers = len(layer_dims) - 1
    off = 0
    w_off, b_off, s_off, t_off = [], [], [], []
    for i in range(n_layers):
        w_off.append(off)
        off += layer_dims[i + 1] * layer_dims[i]
        b_off.append(off)
        off += layer_dims[i + 1]
    for i in range(n_layers - 1):
        s_off.append(off)
        off += layer_dims[i + 1]
        t_off.append(off)
        off += layer_dims[i + 1]
    return PackedLayout(tuple(layer_dims), tuple(w_off), tuple(b_off),
                        tuple(s_off), tuple(t_off), off)


def pack_params(layout: PackedLayout, linear_params, bn_params, eps=1e-5):
    """Pack 4 Linear + 3 eval-mode BatchNorm1d layers into one 1-D f32 vector.

    linear_params: list of (W [out,in], b [out])   (PyTorch nn.Linear convention)
    bn_params:     list of (gamma, beta, running_mean, running_var), each [n]
    """
    vals = jnp.zeros((layout.size,), jnp.float32)
    for i, (w, b) in enumerate(linear_params):
        k_in, n_out = layout.dims[i], layout.dims[i + 1]
        assert w.shape == (n_out, k_in)
        vals = vals.at[layout.w_off[i]:layout.w_off[i] + n_out * k_in].set(
            w.reshape(-1).astype(jnp.float32))
        vals = vals.at[layout.b_off[i]:layout.b_off[i] + n_out].set(
            b.astype(jnp.float32))
    for i, (gamma, beta, mean, var) in enumerate(bn_params):
        n = layout.dims[i + 1]
        scale = gamma / jnp.sqrt(var + eps)          # exact eval-mode BN fold
        shift = beta - mean * scale
        vals = vals.at[layout.s_off[i]:layout.s_off[i] + n].set(scale.astype(jnp.float32))
        vals = vals.at[layout.t_off[i]:layout.t_off[i] + n].set(shift.astype(jnp.float32))
    return vals


def _mlp_bn_tanh_kernel(p_ref, x_ref, o_ref, *, dims, w_off, b_off, s_off, t_off):
    """Fused Linear->BN(eval)->tanh x3 + final Linear. Feature-major, VPU/EUP only.

    p_ref : SMEM f32[size]            packed scalars (W, b, BN scale/shift)
    x_ref : VMEM f32[in_f, R, 128]    batch spread over (sublanes, lanes)
    o_ref : VMEM f32[out_f, R, 128]   lane-dense output
    """
    n_layers = len(dims) - 1
    # One dense [R, 128] tile per input feature.
    h = [x_ref[k] for k in range(dims[0])]
    for layer in range(n_layers):
        k_in, n_out = dims[layer], dims[layer + 1]
        z = []
        for n in range(n_out):
            w0 = w_off[layer] + n * k_in
            # Unrolled scalar*vector FMAs (K <= 4): no MXU, fully dense on the VPU.
            acc = h[0] * p_ref[w0] + p_ref[b_off[layer] + n]
            for k in range(1, k_in):
                acc = acc + h[k] * p_ref[w0 + k]
            z.append(acc)
        if layer < n_layers - 1:
            # eval-mode BatchNorm1d folded to per-feature scale/shift, then tanh (EUP)
            h = [jnp.tanh(z[n] * p_ref[s_off[layer] + n] + p_ref[t_off[layer] + n])
                 for n in range(n_out)]
        else:
            for n in range(n_out):
                o_ref[n] = z[n].astype(o_ref.dtype)


def _reference_from_packed(x, packed, layout: PackedLayout):
    """Pure-JAX path using the same packed params (small-batch fast path)."""
    dims = layout.dims
    n_layers = len(dims) - 1
    h = x.astype(jnp.float32)
    for i in range(n_layers):
        k_in, n_out = dims[i], dims[i + 1]
        w = packed[layout.w_off[i]:layout.w_off[i] + n_out * k_in].reshape(n_out, k_in)
        b = packed[layout.b_off[i]:layout.b_off[i] + n_out]
        h = h @ w.T + b
        if i < n_layers - 1:
            s = packed[layout.s_off[i]:layout.s_off[i] + n_out]
            t = packed[layout.t_off[i]:layout.t_off[i] + n_out]
            h = jnp.tanh(h * s + t)
    return h


def make_forward(layout: PackedLayout, *, block_rows=256 * 1024,
                 small_batch_threshold=4096):
    in_f, out_f = layout.dims[0], layout.dims[-1]
    assert max(layout.dims) <= _LANES
    kernel = functools.partial(
        _mlp_bn_tanh_kernel, dims=layout.dims, w_off=layout.w_off,
        b_off=layout.b_off, s_off=layout.s_off, t_off=layout.t_off)

    def _pallas_forward(x, packed):
        B = x.shape[0]
        # Rows per grid step: full (8,128) tiles, capped at block_rows, clamped so
        # the grid keeps >= 2 steps when the batch allows (v7x megacore).
        tb = max(_MIN_ROWS, min(block_rows, _round_up(B, _MIN_ROWS)))
        if B >= 2 * _MIN_ROWS:
            tb = min(tb, _round_up(pl.cdiv(B, 2), _MIN_ROWS))
        b_pad = _round_up(B, tb)
        n_blk = b_pad // tb
        rows = tb // _LANES                               # sublane rows per block

        xp = x.astype(jnp.float32)
        if b_pad != B:
            xp = jnp.pad(xp, ((0, b_pad - B), (0, 0)))
        # Feature-major with batch over (sublanes, lanes): [in_f, b_pad/128, 128].
        x3 = xp.T.reshape(in_f, b_pad // _LANES, _LANES)

        out3 = pl.pallas_call(
            kernel,
            out_shape=jax.ShapeDtypeStruct((out_f, b_pad // _LANES, _LANES),
                                           jnp.float32),
            grid_spec=pltpu.PrefetchScalarGridSpec(
                num_scalar_prefetch=0,
                grid=(n_blk,),
                in_specs=[
                    # ~81 packed scalars -> SMEM-resident, read as scalar operands
                    pl.BlockSpec(memory_space=pltpu.MemorySpace.SMEM),
                    pl.BlockSpec((in_f, rows, _LANES), lambda i: (0, i, 0)),
                ],
                out_specs=pl.BlockSpec((out_f, rows, _LANES), lambda i: (0, i, 0)),
            ),
            compiler_params=pltpu.CompilerParams(
                dimension_semantics=("parallel",)),       # megacore split on v7x
        )(packed, x3)

        if out_f == 1:
            out = out3.reshape(b_pad, 1)    # free: identical row-major layout
        else:
            out = out3.reshape(out_f, b_pad).T
        return out[:B]

    @functools.partial(jax.jit, static_argnames=("use_pallas",))
    def forward(x, packed, use_pallas=None):
        if use_pallas is None:
            use_pallas = x.shape[0] >= small_batch_threshold
        if use_pallas:
            return _pallas_forward(x, packed)
        # Small-batch fast path: pallas_call launch + DMA setup would dominate.
        return _reference_from_packed(x, packed, layout)

    return forward


def reference_forward(x, linear_params, bn_params, eps=1e-5):
    """Pure-JAX reference: Linear -> BN(eval) -> tanh (x3), then Linear."""
    h = x
    n = len(linear_params)
    for i, (w, b) in enumerate(linear_params):
        h = h @ w.T + b
        if i < n - 1:
            gamma, beta, mean, var = bn_params[i]
            h = (h - mean) / jnp.sqrt(var + eps) * gamma + beta
            h = jnp.tanh(h)
    return h


def init_torch_like(key, layer_dims):
    """nn.Linear-style uniform init + non-trivial BN running stats / affine."""
    linears, bns = [], []
    n_layers = len(layer_dims) - 1
    for i in range(n_layers):
        fan_in, fan_out = layer_dims[i], layer_dims[i + 1]
        key, kw, kb = jax.random.split(key, 3)
        bound = 1.0 / (fan_in ** 0.5)
        w = jax.random.uniform(kw, (fan_out, fan_in), jnp.float32, -bound, bound)
        b = jax.random.uniform(kb, (fan_out,), jnp.float32, -bound, bound)
        linears.append((w, b))
    for i in range(n_layers - 1):
        n = layer_dims[i + 1]
        key, kg, kb2, km, kv = jax.random.split(key, 5)
        gamma = jax.random.uniform(kg, (n,), jnp.float32, 0.5, 1.5)
        beta = 0.1 * jax.random.normal(kb2, (n,), jnp.float32)
        mean = 0.1 * jax.random.normal(km, (n,), jnp.float32)
        var = jax.random.uniform(kv, (n,), jnp.float32, 0.5, 1.5)
        bns.append((gamma, beta, mean, var))
    return linears, bns


if __name__ == "__main__":
    # Module defaults: in_features=2, hidden 4/4/4, out_features=1.
    layer_dims = (2, 4, 4, 4, 1)
    batch = 8

    key = jax.random.PRNGKey(0)
    key, kx = jax.random.split(key)
    x = jax.random.normal(kx, (batch, layer_dims[0]), jnp.float32)
    linears, bns = init_torch_like(key, layer_dims)

    layout = make_layout(layer_dims)
    packed = pack_params(layout, linears, bns)
    forward = make_forward(layout)

    # Force the Pallas path even at this tiny batch so the kernel is exercised
    # (production dispatch sends B < small_batch_threshold to the pure-JAX path).
    out = jax.block_until_ready(forward(x, packed, use_pallas=True))
    ref = reference_forward(x, linears, bns)

    assert out.shape == (batch, layer_dims[-1])
    assert jnp.allclose(out, ref, atol=1e-5, rtol=1e-5), "pallas vs reference mismatch"

    # Small-batch fast path must agree too.
    out_small = jax.block_until_ready(forward(x, packed))
    assert jnp.allclose(out_small, ref, atol=1e-5, rtol=1e-5), "fast path mismatch"

    print("KERNEL_OK")
</pallas_src>

<mosaic_0001>
module attributes {stable_mosaic.version = 11 : i64} {
  func.func @_mlp_bn_tanh_kernel(%arg0: i32, %arg1: memref<81xf32, #tpu.memory_space<smem>>, %arg2: memref<2x8x128xf32, #tpu.memory_space<vmem>>, %arg3: memref<1x8x128xf32, #tpu.memory_space<vmem>>) attributes {dimension_semantics = [#tpu.dimension_semantics<parallel>], iteration_bounds = array<i64: 1>, scalar_prefetch = 0 : i64, scratch_operands = 0 : i64, tpu.core_type = #tpu.core_type<tc>, window_params = [{transform_indices = @transform_0, window_bounds = array<i64: 81>}, {transform_indices = @transform_1, window_bounds = array<i64: 2, 8, 128>}, {transform_indices = @transform_2, window_bounds = array<i64: 1, 8, 128>}]} {
    %c0 = arith.constant 0 : index
    %c0_0 = arith.constant 0 : index
    %c0_1 = arith.constant 0 : index
    %0 = vector.load %arg2[%c0, %c0_0, %c0_1] : memref<2x8x128xf32, #tpu.memory_space<vmem>>, vector<1x8x128xf32>
    %1 = vector.shape_cast %0 : vector<1x8x128xf32> to vector<8x128xf32>
    %c1 = arith.constant 1 : index
    %c0_2 = arith.constant 0 : index
    %c0_3 = arith.constant 0 : index
    %2 = vector.load %arg2[%c1, %c0_2, %c0_3] : memref<2x8x128xf32, #tpu.memory_space<vmem>>, vector<1x8x128xf32>
    %3 = vector.shape_cast %2 : vector<1x8x128xf32> to vector<8x128xf32>
    %c0_4 = arith.constant 0 : index
    %4 = memref.load %arg1[%c0_4] : memref<81xf32, #tpu.memory_space<smem>>
    %5 = vector.broadcast %4 : f32 to vector<8x128xf32>
    %6 = arith.mulf %1, %5 : vector<8x128xf32>
    %c8 = arith.constant 8 : index
    %7 = memref.load %arg1[%c8] : memref<81xf32, #tpu.memory_space<smem>>
    %8 = vector.broadcast %7 : f32 to vector<8x128xf32>
    %9 = arith.addf %6, %8 : vector<8x128xf32>
    %c1_5 = arith.constant 1 : index
    %10 = memref.load %arg1[%c1_5] : memref<81xf32, #tpu.memory_space<smem>>
    %11 = vector.broadcast %10 : f32 to vector<8x128xf32>
    %12 = arith.mulf %3, %11 : vector<8x128xf32>
    %13 = arith.addf %9, %12 : vector<8x128xf32>
    %c2 = arith.constant 2 : index
    %14 = memref.load %arg1[%c2] : memref<81xf32, #tpu.memory_space<smem>>
    %15 = vector.broadcast %14 : f32 to vector<8x128xf32>
    %16 = arith.mulf %1, %15 : vector<8x128xf32>
    %c9 = arith.constant 9 : index
    %17 = memref.load %arg1[%c9] : memref<81xf32, #tpu.memory_space<smem>>
    %18 = vector.broadcast %17 : f32 to vector<8x128xf32>
    %19 = arith.addf %16, %18 : vector<8x128xf32>
    %c3 = arith.constant 3 : index
    %20 = memref.load %arg1[%c3] : memref<81xf32, #tpu.memory_space<smem>>
    %21 = vector.broadcast %20 : f32 to vector<8x128xf32>
    %22 = arith.mulf %3, %21 : vector<8x128xf32>
    %23 = arith.addf %19, %22 : vector<8x128xf32>
    %c4 = arith.constant 4 : index
    %24 = memref.load %arg1[%c4] : memref<81xf32, #tpu.memory_space<smem>>
    %25 = vector.broadcast %24 : f32 to vector<8x128xf32>
    %26 = arith.mulf %1, %25 : vector<8x128xf32>
    %c10 = arith.constant 10 : index
    %27 = memref.load %arg1[%c10] : memref<81xf32, #tpu.memory_space<smem>>
    %28 = vector.broadcast %27 : f32 to vector<8x128xf32>
    %29 = arith.addf %26, %28 : vector<8x128xf32>
    %c5 = arith.constant 5 : index
    %30 = memref.load %arg1[%c5] : memref<81xf32, #tpu.memory_space<smem>>
    %31 = vector.broadcast %30 : f32 to vector<8x128xf32>
    %32 = arith.mulf %3, %31 : vector<8x128xf32>
    %33 = arith.addf %29, %32 : vector<8x128xf32>
    %c6 = arith.constant 6 : index
    %34 = memref.load %arg1[%c6] : memref<81xf32, #tpu.memory_space<smem>>
    %35 = vector.broadcast %34 : f32 to vector<8x128xf32>
    %36 = arith.mulf %1, %35 : vector<8x128xf32>
    %c11 = arith.constant 11 : index
    %37 = memref.load %arg1[%c11] : memref<81xf32, #tpu.memory_space<smem>>
    %38 = vector.broadcast %37 : f32 to vector<8x128xf32>
    %39 = arith.addf %36, %38 : vector<8x128xf32>
    %c7 = arith.constant 7 : index
    %40 = memref.load %arg1[%c7] : memref<81xf32, #tpu.memory_space<smem>>
    %41 = vector.broadcast %40 : f32 to vector<8x128xf32>
    %42 = arith.mulf %3, %41 : vector<8x128xf32>
    %43 = arith.addf %39, %42 : vector<8x128xf32>
    %c57 = arith.constant 57 : index
    %44 = memref.load %arg1[%c57] : memref<81xf32, #tpu.memory_space<smem>>
    %45 = vector.broadcast %44 : f32 to vector<8x128xf32>
    %46 = arith.mulf %13, %45 : vector<8x128xf32>
    %c61 = arith.constant 61 : index
    %47 = memref.load %arg1[%c61] : memref<81xf32, #tpu.memory_space<smem>>
    %48 = vector.broadcast %47 : f32 to vector<8x128xf32>
    %49 = arith.addf %46, %48 : vector<8x128xf32>
    %50 = math.tanh %49 : vector<8x128xf32>
    %c58 = arith.constant 58 : index
    %51 = memref.load %arg1[%c58] : memref<81xf32, #tpu.memory_space<smem>>
    %52 = vector.broadcast %51 : f32 to vector<8x128xf32>
    %53 = arith.mulf %23, %52 : vector<8x128xf32>
    %c62 = arith.constant 62 : index
    %54 = memref.load %arg1[%c62] : memref<81xf32, #tpu.memory_space<smem>>
    %55 = vector.broadcast %54 : f32 to vector<8x128xf32>
    %56 = arith.addf %53, %55 : vector<8x128xf32>
    %57 = math.tanh %56 : vector<8x128xf32>
    %c59 = arith.constant 59 : index
    %58 = memref.load %arg1[%c59] : memref<81xf32, #tpu.memory_space<smem>>
    %59 = vector.broadcast %58 : f32 to vector<8x128xf32>
    %60 = arith.mulf %33, %59 : vector<8x128xf32>
    %c63 = arith.constant 63 : index
    %61 = memref.load %arg1[%c63] : memref<81xf32, #tpu.memory_space<smem>>
    %62 = vector.broadcast %61 : f32 to vector<8x128xf32>
    %63 = arith.addf %60, %62 : vector<8x128xf32>
    %64 = math.tanh %63 : vector<8x128xf32>
    %c60 = arith.constant 60 : index
    %65 = memref.load %arg1[%c60] : memref<81xf32, #tpu.memory_space<smem>>
    %66 = vector.broadcast %65 : f32 to vector<8x128xf32>
    %67 = arith.mulf %43, %66 : vector<8x128xf32>
    %c64 = arith.constant 64 : index
    %68 = memref.load %arg1[%c64] : memref<81xf32, #tpu.memory_space<smem>>
    %69 = vector.broadcast %68 : f32 to vector<8x128xf32>
    %70 = arith.addf %67, %69 : vector<8x128xf32>
    %71 = math.tanh %70 : vector<8x128xf32>
    %c12 = arith.constant 12 : index
    %72 = memref.load %arg1[%c12] : memref<81xf32, #tpu.memory_space<smem>>
    %73 = vector.broadcast %72 : f32 to vector<8x128xf32>
    %74 = arith.mulf %50, %73 : vector<8x128xf32>
    %c28 = arith.constant 28 : index
    %75 = memref.load %arg1[%c28] : memref<81xf32, #tpu.memory_space<smem>>
    %76 = vector.broadcast %75 : f32 to vector<8x128xf32>
    %77 = arith.addf %74, %76 : vector<8x128xf32>
    %c13 = arith.constant 13 : index
    %78 = memref.load %arg1[%c13] : memref<81xf32, #tpu.memory_space<smem>>
    %79 = vector.broadcast %78 : f32 to vector<8x128xf32>
    %80 = arith.mulf %57, %79 : vector<8x128xf32>
    %81 = arith.addf %77, %80 : vector<8x128xf32>
    %c14 = arith.constant 14 : index
    %82 = memref.load %arg1[%c14] : memref<81xf32, #tpu.memory_space<smem>>
    %83 = vector.broadcast %82 : f32 to vector<8x128xf32>
    %84 = arith.mulf %64, %83 : vector<8x128xf32>
    %85 = arith.addf %81, %84 : vector<8x128xf32>
    %c15 = arith.constant 15 : index
    %86 = memref.load %arg1[%c15] : memref<81xf32, #tpu.memory_space<smem>>
    %87 = vector.broadcast %86 : f32 to vector<8x128xf32>
    %88 = arith.mulf %71, %87 : vector<8x128xf32>
    %89 = arith.addf %85, %88 : vector<8x128xf32>
    %c16 = arith.constant 16 : index
    %90 = memref.load %arg1[%c16] : memref<81xf32, #tpu.memory_space<smem>>
    %91 = vector.broadcast %90 : f32 to vector<8x128xf32>
    %92 = arith.mulf %50, %91 : vector<8x128xf32>
    %c29 = arith.constant 29 : index
    %93 = memref.load %arg1[%c29] : memref<81xf32, #tpu.memory_space<smem>>
    %94 = vector.broadcast %93 : f32 to vector<8x128xf32>
    %95 = arith.addf %92, %94 : vector<8x128xf32>
    %c17 = arith.constant 17 : index
    %96 = memref.load %arg1[%c17] : memref<81xf32, #tpu.memory_space<smem>>
    %97 = vector.broadcast %96 : f32 to vector<8x128xf32>
    %98 = arith.mulf %57, %97 : vector<8x128xf32>
    %99 = arith.addf %95, %98 : vector<8x128xf32>
    %c18 = arith.constant 18 : index
    %100 = memref.load %arg1[%c18] : memref<81xf32, #tpu.memory_space<smem>>
    %101 = vector.broadcast %100 : f32 to vector<8x128xf32>
    %102 = arith.mulf %64, %101 : vector<8x128xf32>
    %103 = arith.addf %99, %102 : vector<8x128xf32>
    %c19 = arith.constant 19 : index
    %104 = memref.load %arg1[%c19] : memref<81xf32, #tpu.memory_space<smem>>
    %105 = vector.broadcast %104 : f32 to vector<8x128xf32>
    %106 = arith.mulf %71, %105 : vector<8x128xf32>
    %107 = arith.addf %103, %106 : vector<8x128xf32>
    %c20 = arith.constant 20 : index
    %108 = memref.load %arg1[%c20] : memref<81xf32, #tpu.memory_space<smem>>
    %109 = vector.broadcast %108 : f32 to vector<8x128xf32>
    %110 = arith.mulf %50, %109 : vector<8x128xf32>
    %c30 = arith.constant 30 : index
    %111 = memref.load %arg1[%c30] : memref<81xf32, #tpu.memory_space<smem>>
    %112 = vector.broadcast %111 : f32 to vector<8x128xf32>
    %113 = arith.addf %110, %112 : vector<8x128xf32>
    %c21 = arith.constant 21 : index
    %114 = memref.load %arg1[%c21] : memref<81xf32, #tpu.memory_space<smem>>
    %115 = vector.broadcast %114 : f32 to vector<8x128xf32>
    %116 = arith.mulf %57, %115 : vector<8x128xf32>
    %117 = arith.addf %113, %116 : vector<8x128xf32>
    %c22 = arith.constant 22 : index
    %118 = memref.load %arg1[%c22] : memref<81xf32, #tpu.memory_space<smem>>
    %119 = vector.broadcast %118 : f32 to vector<8x128xf32>
    %120 = arith.mulf %64, %119 : vector<8x128xf32>
    %121 = arith.addf %117, %120 : vector<8x128xf32>
    %c23 = arith.constant 23 : index
    %122 = memref.load %arg1[%c23] : memref<81xf32, #tpu.memory_space<smem>>
    %123 = vector.broadcast %122 : f32 to vector<8x128xf32>
    %124 = arith.mulf %71, %123 : vector<8x128xf32>
    %125 = arith.addf %121, %124 : vector<8x128xf32>
    %c24 = arith.constant 24 : index
    %126 = memref.load %arg1[%c24] : memref<81xf32, #tpu.memory_space<smem>>
    %127 = vector.broadcast %126 : f32 to vector<8x128xf32>
    %128 = arith.mulf %50, %127 : vector<8x128xf32>
    %c31 = arith.constant 31 : index
    %129 = memref.load %arg1[%c31] : memref<81xf32, #tpu.memory_space<smem>>
    %130 = vector.broadcast %129 : f32 to vector<8x128xf32>
    %131 = arith.addf %128, %130 : vector<8x128xf32>
    %c25 = arith.constant 25 : index
    %132 = memref.load %arg1[%c25] : memref<81xf32, #tpu.memory_space<smem>>
    %133 = vector.broadcast %132 : f32 to vector<8x128xf32>
    %134 = arith.mulf %57, %133 : vector<8x128xf32>
    %135 = arith.addf %131, %134 : vector<8x128xf32>
    %c26 = arith.constant 26 : index
    %136 = memref.load %arg1[%c26] : memref<81xf32, #tpu.memory_space<smem>>
    %137 = vector.broadcast %136 : f32 to vector<8x128xf32>
    %138 = arith.mulf %64, %137 : vector<8x128xf32>
    %139 = arith.addf %135, %138 : vector<8x128xf32>
    %c27 = arith.constant 27 : index
    %140 = memref.load %arg1[%c27] : memref<81xf32, #tpu.memory_space<smem>>
    %141 = vector.broadcast %140 : f32 to vector<8x128xf32>
    %142 = arith.mulf %71, %141 : vector<8x128xf32>
    %143 = arith.addf %139, %142 : vector<8x128xf32>
    %c65 = arith.constant 65 : index
    %144 = memref.load %arg1[%c65] : memref<81xf32, #tpu.memory_space<smem>>
    %145 = vector.broadcast %144 : f32 to vector<8x128xf32>
    %146 = arith.mulf %89, %145 : vector<8x128xf32>
    %c69 = arith.constant 69 : index
    %147 = memref.load %arg1[%c69] : memref<81xf32, #tpu.memory_space<smem>>
    %148 = vector.broadcast %147 : f32 to vector<8x128xf32>
    %149 = arith.addf %146, %148 : vector<8x128xf32>
    %150 = math.tanh %149 : vector<8x128xf32>
    %c66 = arith.constant 66 : index
    %151 = memref.load %arg1[%c66] : memref<81xf32, #tpu.memory_space<smem>>
    %152 = vector.broadcast %151 : f32 to vector<8x128xf32>
    %153 = arith.mulf %107, %152 : vector<8x128xf32>
    %c70 = arith.constant 70 : index
    %154 = memref.load %arg1[%c70] : memref<81xf32, #tpu.memory_space<smem>>
    %155 = vector.broadcast %154 : f32 to vector<8x128xf32>
    %156 = arith.addf %153, %155 : vector<8x128xf32>
    %157 = math.tanh %156 : vector<8x128xf32>
    %c67 = arith.constant 67 : index
    %158 = memref.load %arg1[%c67] : memref<81xf32, #tpu.memory_space<smem>>
    %159 = vector.broadcast %158 : f32 to vector<8x128xf32>
    %160 = arith.mulf %125, %159 : vector<8x128xf32>
    %c71 = arith.constant 71 : index
    %161 = memref.load %arg1[%c71] : memref<81xf32, #tpu.memory_space<smem>>
    %162 = vector.broadcast %161 : f32 to vector<8x128xf32>
    %163 = arith.addf %160, %162 : vector<8x128xf32>
    %164 = math.tanh %163 : vector<8x128xf32>
    %c68 = arith.constant 68 : index
    %165 = memref.load %arg1[%c68] : memref<81xf32, #tpu.memory_space<smem>>
    %166 = vector.broadcast %165 : f32 to vector<8x128xf32>
    %167 = arith.mulf %143, %166 : vector<8x128xf32>
    %c72 = arith.constant 72 : index
    %168 = memref.load %arg1[%c72] : memref<81xf32, #tpu.memory_space<smem>>
    %169 = vector.broadcast %168 : f32 to vector<8x128xf32>
    %170 = arith.addf %167, %169 : vector<8x128xf32>
    %171 = math.tanh %170 : vector<8x128xf32>
    %c32 = arith.constant 32 : index
    %172 = memref.load %arg1[%c32] : memref<81xf32, #tpu.memory_space<smem>>
    %173 = vector.broadcast %172 : f32 to vector<8x128xf32>
    %174 = arith.mulf %150, %173 : vector<8x128xf32>
    %c48 = arith.constant 48 : index
    %175 = memref.load %arg1[%c48] : memref<81xf32, #tpu.memory_space<smem>>
    %176 = vector.broadcast %175 : f32 to vector<8x128xf32>
    %177 = arith.addf %174, %176 : vector<8x128xf32>
    %c33 = arith.constant 33 : index
    %178 = memref.load %arg1[%c33] : memref<81xf32, #tpu.memory_space<smem>>
    %179 = vector.broadcast %178 : f32 to vector<8x128xf32>
    %180 = arith.mulf %157, %179 : vector<8x128xf32>
    %181 = arith.addf %177, %180 : vector<8x128xf32>
    %c34 = arith.constant 34 : index
    %182 = memref.load %arg1[%c34] : memref<81xf32, #tpu.memory_space<smem>>
    %183 = vector.broadcast %182 : f32 to vector<8x128xf32>
    %184 = arith.mulf %164, %183 : vector<8x128xf32>
    %185 = arith.addf %181, %184 : vector<8x128xf32>
    %c35 = arith.constant 35 : index
    %186 = memref.load %arg1[%c35] : memref<81xf32, #tpu.memory_space<smem>>
    %187 = vector.broadcast %186 : f32 to vector<8x128xf32>
    %188 = arith.mulf %171, %187 : vector<8x128xf32>
    %189 = arith.addf %185, %188 : vector<8x128xf32>
    %c36 = arith.constant 36 : index
    %190 = memref.load %arg1[%c36] : memref<81xf32, #tpu.memory_space<smem>>
    %191 = vector.broadcast %190 : f32 to vector<8x128xf32>
    %192 = arith.mulf %150, %191 : vector<8x128xf32>
    %c49 = arith.constant 49 : index
    %193 = memref.load %arg1[%c49] : memref<81xf32, #tpu.memory_space<smem>>
    %194 = vector.broadcast %193 : f32 to vector<8x128xf32>
    %195 = arith.addf %192, %194 : vector<8x128xf32>
    %c37 = arith.constant 37 : index
    %196 = memref.load %arg1[%c37] : memref<81xf32, #tpu.memory_space<smem>>
    %197 = vector.broadcast %196 : f32 to vector<8x128xf32>
    %198 = arith.mulf %157, %197 : vector<8x128xf32>
    %199 = arith.addf %195, %198 : vector<8x128xf32>
    %c38 = arith.constant 38 : index
    %200 = memref.load %arg1[%c38] : memref<81xf32, #tpu.memory_space<smem>>
    %201 = vector.broadcast %200 : f32 to vector<8x128xf32>
    %202 = arith.mulf %164, %201 : vector<8x128xf32>
    %203 = arith.addf %199, %202 : vector<8x128xf32>
    %c39 = arith.constant 39 : index
    %204 = memref.load %arg1[%c39] : memref<81xf32, #tpu.memory_space<smem>>
    %205 = vector.broadcast %204 : f32 to vector<8x128xf32>
    %206 = arith.mulf %171, %205 : vector<8x128xf32>
    %207 = arith.addf %203, %206 : vector<8x128xf32>
    %c40 = arith.constant 40 : index
    %208 = memref.load %arg1[%c40] : memref<81xf32, #tpu.memory_space<smem>>
    %209 = vector.broadcast %208 : f32 to vector<8x128xf32>
    %210 = arith.mulf %150, %209 : vector<8x128xf32>
    %c50 = arith.constant 50 : index
    %211 = memref.load %arg1[%c50] : memref<81xf32, #tpu.memory_space<smem>>
    %212 = vector.broadcast %211 : f32 to vector<8x128xf32>
    %213 = arith.addf %210, %212 : vector<8x128xf32>
    %c41 = arith.constant 41 : index
    %214 = memref.load %arg1[%c41] : memref<81xf32, #tpu.memory_space<smem>>
    %215 = vector.broadcast %214 : f32 to vector<8x128xf32>
    %216 = arith.mulf %157, %215 : vector<8x128xf32>
    %217 = arith.addf %213, %216 : vector<8x128xf32>
    %c42 = arith.constant 42 : index
    %218 = memref.load %arg1[%c42] : memref<81xf32, #tpu.memory_space<smem>>
    %219 = vector.broadcast %218 : f32 to vector<8x128xf32>
    %220 = arith.mulf %164, %219 : vector<8x128xf32>
    %221 = arith.addf %217, %220 : vector<8x128xf32>
    %c43 = arith.constant 43 : index
    %222 = memref.load %arg1[%c43] : memref<81xf32, #tpu.memory_space<smem>>
    %223 = vector.broadcast %222 : f32 to vector<8x128xf32>
    %224 = arith.mulf %171, %223 : vector<8x128xf32>
    %225 = arith.addf %221, %224 : vector<8x128xf32>
    %c44 = arith.constant 44 : index
    %226 = memref.load %arg1[%c44] : memref<81xf32, #tpu.memory_space<smem>>
    %227 = vector.broadcast %226 : f32 to vector<8x128xf32>
    %228 = arith.mulf %150, %227 : vector<8x128xf32>
    %c51 = arith.constant 51 : index
    %229 = memref.load %arg1[%c51] : memref<81xf32, #tpu.memory_space<smem>>
    %230 = vector.broadcast %229 : f32 to vector<8x128xf32>
    %231 = arith.addf %228, %230 : vector<8x128xf32>
    %c45 = arith.constant 45 : index
    %232 = memref.load %arg1[%c45] : memref<81xf32, #tpu.memory_space<smem>>
    %233 = vector.broadcast %232 : f32 to vector<8x128xf32>
    %234 = arith.mulf %157, %233 : vector<8x128xf32>
    %235 = arith.addf %231, %234 : vector<8x128xf32>
    %c46 = arith.constant 46 : index
    %236 = memref.load %arg1[%c46] : memref<81xf32, #tpu.memory_space<smem>>
    %237 = vector.broadcast %236 : f32 to vector<8x128xf32>
    %238 = arith.mulf %164, %237 : vector<8x128xf32>
    %239 = arith.addf %235, %238 : vector<8x128xf32>
    %c47 = arith.constant 47 : index
    %240 = memref.load %arg1[%c47] : memref<81xf32, #tpu.memory_space<smem>>
    %241 = vector.broadcast %240 : f32 to vector<8x128xf32>
    %242 = arith.mulf %171, %241 : vector<8x128xf32>
    %243 = arith.addf %239, %242 : vector<8x128xf32>
    %c73 = arith.constant 73 : index
    %244 = memref.load %arg1[%c73] : memref<81xf32, #tpu.memory_space<smem>>
    %245 = vector.broadcast %244 : f32 to vector<8x128xf32>
    %246 = arith.mulf %189, %245 : vector<8x128xf32>
    %c77 = arith.constant 77 : index
    %247 = memref.load %arg1[%c77] : memref<81xf32, #tpu.memory_space<smem>>
    %248 = vector.broadcast %247 : f32 to vector<8x128xf32>
    %249 = arith.addf %246, %248 : vector<8x128xf32>
    %250 = math.tanh %249 : vector<8x128xf32>
    %c74 = arith.constant 74 : index
    %251 = memref.load %arg1[%c74] : memref<81xf32, #tpu.memory_space<smem>>
    %252 = vector.broadcast %251 : f32 to vector<8x128xf32>
    %253 = arith.mulf %207, %252 : vector<8x128xf32>
    %c78 = arith.constant 78 : index
    %254 = memref.load %arg1[%c78] : memref<81xf32, #tpu.memory_space<smem>>
    %255 = vector.broadcast %254 : f32 to vector<8x128xf32>
    %256 = arith.addf %253, %255 : vector<8x128xf32>
    %257 = math.tanh %256 : vector<8x128xf32>
    %c75 = arith.constant 75 : index
    %258 = memref.load %arg1[%c75] : memref<81xf32, #tpu.memory_space<smem>>
    %259 = vector.broadcast %258 : f32 to vector<8x128xf32>
    %260 = arith.mulf %225, %259 : vector<8x128xf32>
    %c79 = arith.constant 79 : index
    %261 = memref.load %arg1[%c79] : memref<81xf32, #tpu.memory_space<smem>>
    %262 = vector.broadcast %261 : f32 to vector<8x128xf32>
    %263 = arith.addf %260, %262 : vector<8x128xf32>
    %264 = math.tanh %263 : vector<8x128xf32>
    %c76 = arith.constant 76 : index
    %265 = memref.load %arg1[%c76] : memref<81xf32, #tpu.memory_space<smem>>
    %266 = vector.broadcast %265 : f32 to vector<8x128xf32>
    %267 = arith.mulf %243, %266 : vector<8x128xf32>
    %c80 = arith.constant 80 : index
    %268 = memref.load %arg1[%c80] : memref<81xf32, #tpu.memory_space<smem>>
    %269 = vector.broadcast %268 : f32 to vector<8x128xf32>
    %270 = arith.addf %267, %269 : vector<8x128xf32>
    %271 = math.tanh %270 : vector<8x128xf32>
    %c52 = arith.constant 52 : index
    %272 = memref.load %arg1[%c52] : memref<81xf32, #tpu.memory_space<smem>>
    %273 = vector.broadcast %272 : f32 to vector<8x128xf32>
    %274 = arith.mulf %250, %273 : vector<8x128xf32>
    %c56 = arith.constant 56 : index
    %275 = memref.load %arg1[%c56] : memref<81xf32, #tpu.memory_space<smem>>
    %276 = vector.broadcast %275 : f32 to vector<8x128xf32>
    %277 = arith.addf %274, %276 : vector<8x128xf32>
    %c53 = arith.constant 53 : index
    %278 = memref.load %arg1[%c53] : memref<81xf32, #tpu.memory_space<smem>>
    %279 = vector.broadcast %278 : f32 to vector<8x128xf32>
    %280 = arith.mulf %257, %279 : vector<8x128xf32>
    %281 = arith.addf %277, %280 : vector<8x128xf32>
    %c54 = arith.constant 54 : index
    %282 = memref.load %arg1[%c54] : memref<81xf32, #tpu.memory_space<smem>>
    %283 = vector.broadcast %282 : f32 to vector<8x128xf32>
    %284 = arith.mulf %264, %283 : vector<8x128xf32>
    %285 = arith.addf %281, %284 : vector<8x128xf32>
    %c55 = arith.constant 55 : index
    %286 = memref.load %arg1[%c55] : memref<81xf32, #tpu.memory_space<smem>>
    %287 = vector.broadcast %286 : f32 to vector<8x128xf32>
    %288 = arith.mulf %271, %287 : vector<8x128xf32>
    %289 = arith.addf %285, %288 : vector<8x128xf32>
    %c0_6 = arith.constant 0 : index
    %c0_7 = arith.constant 0 : index
    %c0_8 = arith.constant 0 : index
    %290 = vector.load %arg3[%c0_6, %c0_7, %c0_8] : memref<1x8x128xf32, #tpu.memory_space<vmem>>, vector<1x8x128xf32>
    %291 = vector.shape_cast %290 : vector<1x8x128xf32> to vector<8x128xf32>
    %292 = vector.shape_cast %289 : vector<8x128xf32> to vector<1x8x128xf32>
    tpu.vector_store %arg3[%c0_6, %c0_7, %c0_8], %292 {strides = array<i32>} : memref<1x8x128xf32, #tpu.memory_space<vmem>>, vector<1x8x128xf32>,
    return
  }
  func.func @transform_0(%arg0: i32) -> i32 {
    %c0_i32 = arith.constant 0 : i32
    %c0_i32_0 = arith.constant 0 : i32
    return %c0_i32 : i32
  }
  func.func @transform_1(%arg0: i32) -> (i32, i32, i32) {
    %c0_i32 = arith.constant 0 : i32
    %c0_i32_0 = arith.constant 0 : i32
    %c0_i32_1 = arith.constant 0 : i32
    return %c0_i32, %arg0, %c0_i32_0 : i32, i32, i32
  }
  func.func @transform_2(%arg0: i32) -> (i32, i32, i32) {
    %c0_i32 = arith.constant 0 : i32
    %c0_i32_0 = arith.constant 0 : i32
    %c0_i32_1 = arith.constant 0 : i32
    return %c0_i32, %arg0, %c0_i32_0 : i32, i32, i32
  }
}

</mosaic_0001>

<bundles_post_ra>
// kernel: forward.1
= control target key start
LH: loop header
LB: loop body
LE: loop exit
PB: predicated region body
PF: predicated region fallthrough
CT: control target
= control target key end

     0   :  { %7 = vsyncpa [#allocation3], 0  ;;  %s593_s0 = inlined_call_operand.vmem [shape: f32[81], index: 0, kind: input, shape index: {}]   ;;  %s594_s1 = inlined_call_operand.vmem [shape: f32[2,8,128], index: 1, kind: input, shape index: {}]   ;;  %s595_s2 = inlined_call_operand.vmem [shape: f32[1,8,128], index: 2, kind: output, shape index: {}]  }
   0x1   :  { %s14_s11 = sshll.u32 %s593_s0, 4  ;;  %s15_s11 = int_to_ptr.vmem [resolvable:$true] %s14_s11 }
   0x2   :  { %s425_s12 = scalar_lea.vmem %s15_s11, 16  ;;  %p430_p1 = scmp.lt.s32.totalorder %s15_s11, %s15_s11 }
   0x3   :  { %p426_p0 = scmp.ne.s32.totalorder %s15_s11, %s425_s12  ;;  %p431_p2 = scmp.lt.s32.totalorder %s425_s12, %s425_s12 }
   0x5   :  { %p432_p3 = por %p431_p2, %p430_p1 }
   0x7   :  { %p433_p4 = pnand %p432_p3, %p426_p0 }
   0x9   :  { %436 = shalt.err (!%p433_p4)
}
   0xa   :  { %s439_s13 = smov [#allocation2]  }
   0xb   :  { %17 = dma.vmem_to_smem %s15_s11, 16, %s439_s13, [#allocation3]  }
   0xc   :  { %437 = dma.done.wait [#allocation3], 16  }
   0xd   :  { %438 = vsyncadd [#allocation3], 4294967280 }
   0xe   :  { %23 = sfence }
   0xf   :  { %s27_s14 = sld [smem:[#allocation2]]  ;;  %v24_v0 = vld [vmem:[%s594_s1] sm:$0xff]  ;;  %v319_v3 = vld [vmem:[%s594_s1 + $0x8] sm:$0xff] }
  0x10   :  { %s320_s15 = sld [smem:[#allocation2 + $0x8]] }
  0x11   :  { %s321_s16 = sld [smem:[#allocation2 + $0x1]] }
  0x12   :  { %s322_s17 = sld [smem:[#allocation2 + $0x2]] }
  0x13   :  { %s323_s0 = sld [smem:[#allocation2 + $0x9]] }
  0x14   :  { %s324_s20 = sld [smem:[#allocation2 + $0x3]] }
  0x15   :  { %v28_v1 = vstv %s27_s14  ;;  %s325_s21 = sld [smem:[#allocation2 + $0x4]] }
  0x16   :  { %v29_v2 = vmul.f32 %v28_v1, %v24_v0  ;;  %s326_s22 = sld [smem:[#allocation2 + $0xa]]  ;;  %v31_v4 = vstv %s320_s15 }
  0x17   :  { %v34_v5 = vstv %s321_s16  ;;  %s327_s25 = sld [smem:[#allocation2 + $0x5]] }
  0x18   :  { %v38_v6 = vstv %s322_s17  ;;  %s328_s26 = sld [smem:[#allocation2 + $0x6]]  ;;  %v32_v9 = vadd.f32 %v31_v4, %v29_v2  ;;  %v35_v10 = vmul.f32 %v319_v3, %v34_v5 }
  0x19   :  { %v39_v7 = vmul.f32 %v38_v6, %v24_v0  ;;  %v41_v8 = vstv %s323_s0  ;;  %s329_s27 = sld [smem:[#allocation2 + $0xb]] }
  0x1a   :  { %v44_v11 = vstv %s324_s20  ;;  %s330_s28 = sld [smem:[#allocation2 + $0x7]]  ;;  %v36_v18 = vadd.f32 %v35_v10, %v32_v9 }
  0x1b   :  { %v48_v12 = vstv %s325_s21  ;;  %s331_s29 = sld [smem:[#allocation2 + $0x39]]  ;;  %v42_v13 = vadd.f32 %v41_v8, %v39_v7  ;;  %v45_v14 = vmul.f32 %v319_v3, %v44_v11 }
  0x1c   :  { %v49_v15 = vmul.f32 %v48_v12, %v24_v0  ;;  %v51_v16 = vstv %s326_s22  ;;  %s332_s30 = sld [smem:[#allocation2 + $0x3d]] }
  0x1d   :  { %v54_v17 = vstv %s327_s25  ;;  %s333_s1 = sld [smem:[#allocation2 + $0x3a]]  ;;  %v46_v24 = vadd.f32 %v45_v14, %v42_v13 }
  0x1e   :  { %v52_v19 = vadd.f32 %v51_v16, %v49_v15  ;;  %v55_v20 = vmul.f32 %v319_v3, %v54_v17  ;;  %v58_v21 = vstv %s328_s26  ;;  %s334_s3 = sld [smem:[#allocation2 + $0x3e]] }
  0x1f   :  { %v59_v22 = vmul.f32 %v58_v21, %v24_v0  ;;  %v61_v23 = vstv %s329_s27  ;;  %s335_s4 = sld [smem:[#allocation2 + $0x3b]] }
  0x20   :  { %v64_v25 = vstv %s330_s28  ;;  %s336_s5 = sld [smem:[#allocation2 + $0x3f]]  ;;  %v56_v29 = vadd.f32 %v55_v20, %v52_v19 }
  0x21   :  { %v62_v26 = vadd.f32 %v61_v23, %v59_v22  ;;  %v65_v27 = vmul.f32 %v319_v3, %v64_v25  ;;  %v68_v28 = vstv %s331_s29  ;;  %s337_s6 = sld [smem:[#allocation2 + $0x3c]] }
  0x22   :  { %v69_v30 = vmul.f32 %v68_v28, %v36_v18  ;;  %v71_v31 = vstv %s332_s30  ;;  %s338_s7 = sld [smem:[#allocation2 + $0x40]] }
  0x23   :  { %v75_v32 = vstv %s333_s1  ;;  %s464_s8 = sld [smem:[#allocation2 + $0xc]]  ;;  %v66_v33 = vadd.f32 %v65_v27, %v62_v26 }
  0x24   :  { %v72_v34 = vadd.f32 %v71_v31, %v69_v30  ;;  %v76_v35 = vmul.f32 %v75_v32, %v46_v24  ;;  %v78_v36 = vstv %s334_s3  ;;  %s466_s9 = sld [smem:[#allocation2 + $0x1c]] }
  0x25   :  { %v82_v37 = vstv %s335_s4  ;;  %s468_s10 = sld [smem:[#allocation2 + $0xd]] }
  0x26   :  { %401 = vtanh.f32 %v72_v34  ;;  %v79_v38 = vadd.f32 %v78_v36, %v76_v35  ;;  %v83_v39 = vmul.f32 %v82_v37, %v56_v29  ;;  %v85_v40 = vstv %s336_s5  ;;  %s470_s11 = sld [smem:[#allocation2 + $0xe]] }
  0x27   :  { %v89_v41 = vstv %s337_s6  ;;  %s472_s12 = sld [smem:[#allocation2 + $0xf]] }
  0x28   :  { %403 = vtanh.f32 %v79_v38  ;;  %v86_v42 = vadd.f32 %v85_v40, %v83_v39  ;;  %v90_v43 = vmul.f32 %v89_v41, %v66_v33  ;;  %v92_v44 = vstv %s338_s7  ;;  %s344_s13 = sld [smem:[#allocation2 + $0x10]] }
  0x29   :  { %s474_s14 = sld [smem:[#allocation2 + $0x1d]]  ;;  %v96_v46 = vstv %s464_s8 }
  0x2a   :  { %405 = vtanh.f32 %v86_v42  ;;  %v93_v45 = vadd.f32 %v92_v44, %v90_v43  ;;  %s476_s15 = sld [smem:[#allocation2 + $0x11]]  ;;  %v99_v48 = vstv %s466_s9 }
  0x2b   :  { %s478_s16 = sld [smem:[#allocation2 + $0x12]]  ;;  %v102_v49 = vstv %s468_s10 }
  0x2c   :  { %407 = vtanh.f32 %v93_v45  ;;  %s480_s17 = sld [smem:[#allocation2 + $0x13]]  ;;  %v106_v51 = vstv %s470_s11 }
  0x2d   :  { %s349_s18 = sld [smem:[#allocation2 + $0x14]]  ;;  %v110_v60 = vstv %s472_s12 }
  0x2e   :  { %s482_s19 = sld [smem:[#allocation2 + $0x1e]]  ;;  %v114_v47 = vstv %s344_s13 }
  0x2f   :  { %s484_s0 = sld [smem:[#allocation2 + $0x15]]  ;;  %v117_v52 = vstv %s474_s14 }
  0x30   :  { %s486_s20 = sld [smem:[#allocation2 + $0x16]]  ;;  %v120_v53 = vstv %s476_s15 }
  0x31   :  { %s489_s21 = sld [smem:[#allocation2 + $0x17]]  ;;  %v124_v61 = vstv %s478_s16 }
  0x32   :  { %s493_s22 = sld [smem:[#allocation2 + $0x18]]  ;;  %v128_v62 = vstv %s480_s17 }
  0x33   :  { %v402_v50 = vpop.eup %401  ;;  %v132_v54 = vstv %s349_s18  ;;  %s498_s23 = sld [smem:[#allocation2 + $0x1f]] }
  0x34   :  { %v97_v55 = vmul.f32 %v402_v50, %v96_v46  ;;  %v115_v56 = vmul.f32 %v402_v50, %v114_v47  ;;  %v133_v57 = vmul.f32 %v402_v50, %v132_v54  ;;  %v135_v58 = vstv %s482_s19  ;;  %s501_s24 = sld [smem:[#allocation2 + $0x19]] }
  0x35   :  { %v404_v59 = vpop.eup %403  ;;  %v138_v63 = vstv %s484_s0  ;;  %s507_s25 = sld [smem:[#allocation2 + $0x1a]] }
  0x36   :  { %v100_v0 = vadd.f32 %v99_v48, %v97_v55  ;;  %v103_v1 = vmul.f32 %v404_v59, %v102_v49  ;;  %v118_v2 = vadd.f32 %v117_v52, %v115_v56  ;;  %v121_v3 = vmul.f32 %v404_v59, %v120_v53  ;;  %s509_s26 = sld [smem:[#allocation2 + $0x1b]] }
  0x37   :  { %v406_v4 = vpop.eup %405  ;;  %v136_v5 = vadd.f32 %v135_v58, %v133_v57  ;;  %v139_v6 = vmul.f32 %v404_v59, %v138_v63  ;;  %v142_v7 = vstv %s486_s20  ;;  %v146_v8 = vstv %s489_s21  ;;  %s513_s27 = sld [smem:[#allocation2 + $0x41]] }
  0x38   :  { %v104_v9 = vadd.f32 %v103_v1, %v100_v0  ;;  %v107_v10 = vmul.f32 %v406_v4, %v106_v51  ;;  %v122_v11 = vadd.f32 %v121_v3, %v118_v2  ;;  %v125_v12 = vmul.f32 %v406_v4, %v124_v61  ;;  %s515_s28 = sld [smem:[#allocation2 + $0x45]] }
  0x39   :  { %v408_v13 = vpop.eup %407  ;;  %v140_v14 = vadd.f32 %v139_v6, %v136_v5  ;;  %v143_v15 = vmul.f32 %v406_v4, %v142_v7  ;;  %v150_v16 = vstv %s493_s22  ;;  %v153_v17 = vstv %s498_s23  ;;  %s361_s29 = sld [smem:[#allocation2 + $0x42]] }
  0x3a   :  { %v108_v18 = vadd.f32 %v107_v10, %v104_v9  ;;  %v111_v19 = vmul.f32 %v408_v13, %v110_v60  ;;  %v126_v20 = vadd.f32 %v125_v12, %v122_v11  ;;  %v129_v21 = vmul.f32 %v408_v13, %v128_v62  ;;  %s519_s30 = sld [smem:[#allocation2 + $0x46]] }
  0x3b   :  { %v144_v22 = vadd.f32 %v143_v15, %v140_v14  ;;  %v147_v23 = vmul.f32 %v408_v13, %v146_v8  ;;  %v151_v24 = vmul.f32 %v402_v50, %v150_v16  ;;  %v156_v25 = vstv %s501_s24  ;;  %s363_s1 = sld [smem:[#allocation2 + $0x43]] }
  0x3c   :  { %v112_v26 = vadd.f32 %v111_v19, %v108_v18  ;;  %v130_v27 = vadd.f32 %v129_v21, %v126_v20  ;;  %v157_v28 = vmul.f32 %v404_v59, %v156_v25  ;;  %v160_v29 = vstv %s507_s25  ;;  %s364_s3 = sld [smem:[#allocation2 + $0x47]] }
  0x3d   :  { %v154_v30 = vadd.f32 %v153_v17, %v151_v24  ;;  %v161_v31 = vmul.f32 %v406_v4, %v160_v29  ;;  %v164_v32 = vstv %s509_s26  ;;  %s365_s4 = sld [smem:[#allocation2 + $0x44]]  ;;  %v148_v33 = vadd.f32 %v147_v23, %v144_v22 }
  0x3e   :  { %v168_v34 = vstv %s513_s27  ;;  %v171_v35 = vstv %s515_s28  ;;  %s366_s5 = sld [smem:[#allocation2 + $0x48]]  ;;  %v165_v37 = vmul.f32 %v408_v13, %v164_v32 }
  0x3f   :  { %v158_v36 = vadd.f32 %v157_v28, %v154_v30  ;;  %v169_v38 = vmul.f32 %v168_v34, %v112_v26  ;;  %v175_v39 = vstv %s361_s29  ;;  %s526_s6 = sld [smem:[#allocation2 + $0x20]] }
  0x40   :  { %v176_v40 = vmul.f32 %v175_v39, %v130_v27  ;;  %v178_v41 = vstv %s519_s30  ;;  %s529_s7 = sld [smem:[#allocation2 + $0x30]] }
  0x41   :  { %v162_v42 = vadd.f32 %v161_v31, %v158_v36  ;;  %v172_v43 = vadd.f32 %v171_v35, %v169_v38  ;;  %v182_v44 = vstv %s363_s1  ;;  %s531_s8 = sld [smem:[#allocation2 + $0x21]] }
  0x42   :  { %v179_v45 = vadd.f32 %v178_v41, %v176_v40  ;;  %v183_v46 = vmul.f32 %v182_v44, %v148_v33  ;;  %v185_v47 = vstv %s364_s3  ;;  %s533_s9 = sld [smem:[#allocation2 + $0x22]] }
  0x43   :  { %v166_v48 = vadd.f32 %v165_v37, %v162_v42  ;;  %409 = vtanh.f32 %v172_v43  ;;  %v189_v49 = vstv %s365_s4  ;;  %s535_s10 = sld [smem:[#allocation2 + $0x23]] }
  0x44   :  { %411 = vtanh.f32 %v179_v45  ;;  %v186_v50 = vadd.f32 %v185_v47, %v183_v46  ;;  %v192_v51 = vstv %s366_s5  ;;  %s537_s11 = sld [smem:[#allocation2 + $0x24]] }
  0x45   :  { %v190_v52 = vmul.f32 %v189_v49, %v166_v48  ;;  %s539_s12 = sld [smem:[#allocation2 + $0x31]]  ;;  %v196_v54 = vstv %s526_s6 }
  0x46   :  { %413 = vtanh.f32 %v186_v50  ;;  %s541_s13 = sld [smem:[#allocation2 + $0x25]]  ;;  %v199_v55 = vstv %s529_s7 }
  0x47   :  { %v193_v53 = vadd.f32 %v192_v51, %v190_v52  ;;  %s543_s14 = sld [smem:[#allocation2 + $0x26]]  ;;  %v202_v56 = vstv %s531_s8 }
  0x48   :  { %s545_s15 = sld [smem:[#allocation2 + $0x27]]  ;;  %v206_v58 = vstv %s533_s9 }
  0x49   :  { %415 = vtanh.f32 %v193_v53  ;;  %s377_s16 = sld [smem:[#allocation2 + $0x28]]  ;;  %v210_v59 = vstv %s535_s10 }
  0x4a   :  { %s547_s17 = sld [smem:[#allocation2 + $0x32]]  ;;  %v214_v57 = vstv %s537_s11 }
  0x4b   :  { %s379_s18 = sld [smem:[#allocation2 + $0x29]]  ;;  %v217_v63 = vstv %s539_s12 }
  0x4c   :  { %s549_s19 = sld [smem:[#allocation2 + $0x2a]]  ;;  %v220_v60 = vstv %s541_s13 }
  0x4d   :  { %s551_s0 = sld [smem:[#allocation2 + $0x2b]]  ;;  %v224_v0 = vstv %s543_s14 }
  0x4e   :  { %s557_s20 = sld [smem:[#allocation2 + $0x2c]]  ;;  %v228_v1 = vstv %s545_s15 }
  0x4f   :  { %v232_v61 = vstv %s377_s16  ;;  %s562_s21 = sld [smem:[#allocation2 + $0x33]] }
  0x50   :  { %v410_v62 = vpop.eup %409  ;;  %v235_v2 = vstv %s547_s17  ;;  %s568_s22 = sld [smem:[#allocation2 + $0x2d]] }
  0x51   :  { %v412_v3 = vpop.eup %411  ;;  %v197_v4 = vmul.f32 %v410_v62, %v196_v54  ;;  %v215_v5 = vmul.f32 %v410_v62, %v214_v57  ;;  %v233_v6 = vmul.f32 %v410_v62, %v232_v61  ;;  %v238_v7 = vstv %s379_s18  ;;  %s570_s23 = sld [smem:[#allocation2 + $0x2e]] }
  0x52   :  { %v203_v8 = vmul.f32 %v412_v3, %v202_v56  ;;  %v221_v9 = vmul.f32 %v412_v3, %v220_v60  ;;  %v239_v10 = vmul.f32 %v412_v3, %v238_v7  ;;  %v242_v11 = vstv %s549_s19  ;;  %s573_s24 = sld [smem:[#allocation2 + $0x2f]] }
  0x53   :  { %v414_v12 = vpop.eup %413  ;;  %v200_v13 = vadd.f32 %v199_v55, %v197_v4  ;;  %v218_v14 = vadd.f32 %v217_v63, %v215_v5  ;;  %v236_v15 = vadd.f32 %v235_v2, %v233_v6  ;;  %v246_v16 = vstv %s551_s0  ;;  %s576_s25 = sld [smem:[#allocation2 + $0x49]] }
  0x54   :  { %v207_v17 = vmul.f32 %v414_v12, %v206_v58  ;;  %v225_v18 = vmul.f32 %v414_v12, %v224_v0  ;;  %v243_v19 = vmul.f32 %v414_v12, %v242_v11  ;;  %v250_v20 = vstv %s557_s20  ;;  %s579_s26 = sld [smem:[#allocation2 + $0x4d]] }
  0x55   :  { %v204_v21 = vadd.f32 %v203_v8, %v200_v13  ;;  %v222_v22 = vadd.f32 %v221_v9, %v218_v14  ;;  %v240_v23 = vadd.f32 %v239_v10, %v236_v15  ;;  %v251_v24 = vmul.f32 %v410_v62, %v250_v20  ;;  %s389_s27 = sld [smem:[#allocation2 + $0x4a]] }
  0x56   :  { %v416_v25 = vpop.eup %415  ;;  %v253_v26 = vstv %s562_s21  ;;  %v256_v27 = vstv %s568_s22  ;;  %s583_s28 = sld [smem:[#allocation2 + $0x4e]] }
  0x57   :  { %v208_v28 = vadd.f32 %v207_v17, %v204_v21  ;;  %v211_v29 = vmul.f32 %v416_v25, %v210_v59  ;;  %v226_v30 = vadd.f32 %v225_v18, %v222_v22  ;;  %v229_v31 = vmul.f32 %v416_v25, %v228_v1  ;;  %s391_s29 = sld [smem:[#allocation2 + $0x4b]] }
  0x58   :  { %v244_v32 = vadd.f32 %v243_v19, %v240_v23  ;;  %v247_v33 = vmul.f32 %v416_v25, %v246_v16  ;;  %v254_v34 = vadd.f32 %v253_v26, %v251_v24  ;;  %v257_v35 = vmul.f32 %v412_v3, %v256_v27  ;;  %s392_s30 = sld [smem:[#allocation2 + $0x4f]] }
  0x59   :  { %v212_v36 = vadd.f32 %v211_v29, %v208_v28  ;;  %v230_v37 = vadd.f32 %v229_v31, %v226_v30  ;;  %v260_v38 = vstv %s570_s23  ;;  %v264_v39 = vstv %s573_s24  ;;  %s393_s1 = sld [smem:[#allocation2 + $0x4c]] }
  0x5a   :  { %v248_v40 = vadd.f32 %v247_v33, %v244_v32  ;;  %v258_v41 = vadd.f32 %v257_v35, %v254_v34  ;;  %v261_v42 = vmul.f32 %v414_v12, %v260_v38  ;;  %v265_v43 = vmul.f32 %v416_v25, %v264_v39  ;;  %s394_s3 = sld [smem:[#allocation2 + $0x50]] }
  0x5b   :  { %v268_v44 = vstv %s576_s25  ;;  %v271_v45 = vstv %s579_s26  ;;  %v275_v46 = vstv %s389_s27  ;;  %s395_s4 = sld [smem:[#allocation2 + $0x34]] }
  0x5c   :  { %v262_v47 = vadd.f32 %v261_v42, %v258_v41  ;;  %v269_v48 = vmul.f32 %v268_v44, %v212_v36  ;;  %v276_v49 = vmul.f32 %v275_v46, %v230_v37  ;;  %v278_v50 = vstv %s583_s28  ;;  %s396_s5 = sld [smem:[#allocation2 + $0x38]] }
  0x5d   :  { %v282_v51 = vstv %s391_s29  ;;  %s397_s6 = sld [smem:[#allocation2 + $0x35]] }
  0x5e   :  { %v266_v52 = vadd.f32 %v265_v43, %v262_v47  ;;  %v272_v53 = vadd.f32 %v271_v45, %v269_v48  ;;  %v279_v54 = vadd.f32 %v278_v50, %v276_v49  ;;  %v283_v55 = vmul.f32 %v282_v51, %v248_v40  ;;  %s398_s7 = sld [smem:[#allocation2 + $0x36]] }
  0x5f   :  { %v285_v56 = vstv %s392_s30  ;;  %v289_v57 = vstv %s393_s1  ;;  %s399_s8 = sld [smem:[#allocation2 + $0x37]] }
  0x60   :  { %417 = vtanh.f32 %v272_v53  ;;  %v286_v58 = vadd.f32 %v285_v56, %v283_v55  ;;  %v290_v59 = vmul.f32 %v289_v57, %v266_v52  ;;  %v292_v60 = vstv %s394_s3 }
  0x61   :  { %419 = vtanh.f32 %v279_v54  ;;  %v296_v62 = vstv %s395_s4 }
  0x62   :  { %421 = vtanh.f32 %v286_v58  ;;  %v293_v61 = vadd.f32 %v292_v60, %v290_v59  ;;  %v299_v1 = vstv %s396_s5 }
  0x63   :  { %v302_v63 = vstv %s397_s6 }
  0x64   :  { %423 = vtanh.f32 %v293_v61  ;;  %v306_v2 = vstv %s398_s7 }
  0x65   :  { %v310_v7 = vstv %s399_s8 }
  0x6d   :  { %v418_v0 = vpop.eup %417 }
  0x6e   :  { %v420_v3 = vpop.eup %419  ;;  %v297_v4 = vmul.f32 %v418_v0, %v296_v62 }
  0x6f   :  { %v422_v5 = vpop.eup %421  ;;  %v303_v6 = vmul.f32 %v420_v3, %v302_v63 }
  0x70   :  { %v300_v8 = vadd.f32 %v299_v1, %v297_v4  ;;  %v307_v9 = vmul.f32 %v422_v5, %v306_v2 }
  0x71   :  { %v424_v10 = vpop.eup %423 }
  0x72   :  { %v304_v11 = vadd.f32 %v303_v6, %v300_v8  ;;  %v311_v12 = vmul.f32 %v424_v10, %v310_v7 }
  0x74   :  { %v308_v13 = vadd.f32 %v307_v9, %v304_v11 }
  0x76   :  { %v312_v14 = vadd.f32 %v311_v12, %v308_v13 }
  0x78   :  { %313 = vst [vmem:[%s595_s2] sm:$0xff] %v312_v14 }
  0x79   :  { %318 = vsyncpa [#allocation3], 1 }

</bundles_post_ra>
